<compile_context>
chip_gen: v7x
topology: tpu7x:2x2x1
jax: 0.10.0
libtpu: 0.0.40
codegen_flags: <defaults>
</compile_context>

<pallas_src>
import functools
import math

import jax
import jax.numpy as jnp
from jax import lax
from jax.experimental import pallas as pl
from jax.experimental.pallas import tpu as pltpu

EPS = 1e-5
_HI = lax.Precision.HIGHEST


def _readout_kernel(xt_ref, adj_ref, w1x_ref, w1c_ref, b1_ref,
                    gamma_ref, beta_ref, w2_ref, b2_ref, out_ref,
                    *, mm_dtype, mm_precision):
    xt = xt_ref[...]          # (G, F, N)  node features, nodes on lanes
    a = adj_ref[...]          # (G, N, N)  adjacency (symmetric, 0/1)

    # ---- inp_norm: instance norm over nodes per feature (no affine) ----
    mean = jnp.mean(xt, axis=-1, keepdims=True)
    var = jnp.mean((xt - mean) ** 2, axis=-1, keepdims=True)
    xn = (xt - mean) * lax.rsqrt(var + EPS)

    # ---- act (ReLU) + agg='sum' over nodes ----
    xs = jnp.sum(jnp.maximum(xn, 0.0), axis=-1)          # (G, F)

    # ---- kcycles.k_cycles(adj) ----
    # adj symmetric => a2, a3 symmetric, so diag(a^k) and all traces collapse
    # to elementwise products of a, a2, a3 (no a4/a5/a6, no eye mask).
    a_mm = a.astype(mm_dtype)
    a2 = jnp.einsum('gij,gjk->gik', a_mm, a_mm,
                    precision=mm_precision, preferred_element_type=jnp.float32)
    a3 = jnp.einsum('gij,gjk->gik', a2.astype(mm_dtype), a_mm,
                    precision=mm_precision, preferred_element_type=jnp.float32)

    a2sq = a2 * a2                                        # CSE'd: used by diag4/t3/t5
    d = jnp.sum(a, axis=-1)                               # (G, N) degrees
    diag2 = jnp.sum(a * a, axis=-1)                       # diag(a^2)
    diag3 = jnp.sum(a * a2, axis=-1)                      # diag(a^3)
    diag4 = jnp.sum(a2sq, axis=-1)                        # diag(a^4)
    diag5 = jnp.sum(a2 * a3, axis=-1)                     # diag(a^5)
    diag6 = jnp.sum(a3 * a3, axis=-1)                     # diag(a^6)

    def rsum(v):                                          # (G, N) -> (G, 1)
        return jnp.sum(v, axis=-1, keepdims=True)

    s_d = rsum(d)
    s_d2 = rsum(d * d)
    s3 = rsum(diag3)
    s4 = rsum(diag4)
    s5 = rsum(diag5)
    s6 = rsum(diag6)
    s3d = rsum(diag3 * d)

    k3 = s3 / 6.0
    # sum(a @ d) == sum(d*d) and sum(a @ diag3) == sum(diag3*d) by symmetry,
    # so the lane-sparse (N,N)@(N,1) matvecs disappear.
    k4 = (s4 - 2.0 * s_d2 + s_d) / 8.0
    k5 = (s5 - 3.0 * s3d + s3) / 10.0

    t2 = rsum(diag3 * diag3)
    t3 = rsum(jnp.sum(a * a2sq, axis=-1))
    t5 = s4                                               # trace(a^4) == ||a2||_F^2 (symmetric)
    t7 = rsum(diag2 ** 3)
    t8 = rsum(jnp.sum(a3, axis=-1))
    t9 = rsum(diag2 * diag2)
    t10 = rsum(diag2)
    k6 = (s6 - 3.0 * t2 + 9.0 * t3 - 6.0 * s4 + 6.0 * t5
          - 4.0 * s3 + 4.0 * t7 + 3.0 * t8 - 12.0 * t9 + 12.0 * t10) / 12.0

    # ---- hidden_lin: Linear(F + 4 -> H).  W1 is split into node-feature rows
    # and k-cycle rows so no in-kernel concat is needed; k_i are (G,1) and
    # broadcast against (1,H). ----
    xl = jnp.dot(xs, w1x_ref[...], preferred_element_type=jnp.float32)  # (G, H)
    xl = (xl
          + k3 * w1c_ref[0:1, :]
          + k4 * w1c_ref[1:2, :]
          + k5 * w1c_ref[2:3, :]
          + k6 * w1c_ref[3:4, :]
          + b1_ref[...])

    # ---- hidden_norm: LayerNorm over the hidden dim (affine) ----
    mu = jnp.mean(xl, axis=-1, keepdims=True)
    v = jnp.mean((xl - mu) ** 2, axis=-1, keepdims=True)
    xh = (xl - mu) * lax.rsqrt(v + EPS) * gamma_ref[...] + beta_ref[...]

    # ---- act (ReLU) + out_lin: Linear(H -> out_dim) ----
    xo = jnp.maximum(xh, 0.0)
    out_ref[...] = (jnp.dot(xo, w2_ref[...], preferred_element_type=jnp.float32)
                    + b2_ref[...])


def discriminator_readout(X, adj, params, *, graphs_per_step=8):
    """X: (B, N, F) float32, adj: (B, N, N) float32 -> (B, out_dim) float32."""
    B, N, F = X.shape
    H = params["w1"].shape[1]
    O = params["w2"].shape[1]
    w1x = params["w1"][:F]     # (F, H)   node-feature part of hidden_lin
    w1c = params["w1"][F:]     # (4, H)   k-cycle part of hidden_lin

    # Graphs per grid step: either the whole (small) batch, or a multiple of 8
    # so the (G, O) output block satisfies the sublane constraint.
    G = B if B <= graphs_per_step else graphs_per_step
    B_pad = pl.cdiv(B, G) * G

    # Lane-dense layout: nodes on the lane axis.
    Xt = jnp.swapaxes(X, -1, -2)                          # (B, F, N)
    if B_pad != B:
        Xt = jnp.pad(Xt, ((0, B_pad - B), (0, 0), (0, 0)))
        adj_p = jnp.pad(adj, ((0, B_pad - B), (0, 0), (0, 0)))
    else:
        adj_p = adj

    # bf16 single MXU pass with f32 accumulation is exact for 0/1 adjacency
    # while intermediate entries stay <= 256 (i.e. N <= 256); else f32 HIGHEST.
    if N <= 256:
        mm_dtype, mm_prec = jnp.bfloat16, lax.Precision.DEFAULT
    else:
        mm_dtype, mm_prec = jnp.float32, _HI

    kernel = functools.partial(_readout_kernel, mm_dtype=mm_dtype,
                               mm_precision=mm_prec)

    flops = int(B_pad * (4 * N ** 3 + 16 * N * N
                         + 2 * F * H + 2 * H * O + 10 * H))
    bytes_accessed = int(4 * (B_pad * (N * N + 2 * N * F + O)
                              + (F + 4) * H + 3 * H + H * O + O))
    cost = pl.CostEstimate(flops=flops,
                           transcendentals=int(B_pad * (F + 1)),
                           bytes_accessed=bytes_accessed)

    # Per-step working set (adj double-buffered + a2/a3/squares + X + weights);
    # only raise the scoped VMEM limit when it would actually be exceeded.
    work_bytes = 4 * (10 * G * N * N + 4 * G * N * F
                      + (F + 4) * H + H * O + 4 * H + 2 * O)
    vmem_limit = None
    if work_bytes > (32 << 20):
        vmem_limit = min(work_bytes + (8 << 20), 100 << 20)

    out = pl.pallas_call(
        kernel,
        out_shape=jax.ShapeDtypeStruct((B_pad, O), jnp.float32),
        grid=(B_pad // G,),
        in_specs=[
            pl.BlockSpec((G, F, N), lambda b: (b, 0, 0)),
            pl.BlockSpec((G, N, N), lambda b: (b, 0, 0)),
            pl.BlockSpec((F, H), lambda b: (0, 0)),
            pl.BlockSpec((4, H), lambda b: (0, 0)),
            pl.BlockSpec((1, H), lambda b: (0, 0)),
            pl.BlockSpec((1, H), lambda b: (0, 0)),
            pl.BlockSpec((1, H), lambda b: (0, 0)),
            pl.BlockSpec((H, O), lambda b: (0, 0)),
            pl.BlockSpec((1, O), lambda b: (0, 0)),
        ],
        out_specs=pl.BlockSpec((G, O), lambda b: (b, 0)),
        compiler_params=pltpu.CompilerParams(
            dimension_semantics=("parallel",),
            vmem_limit_bytes=vmem_limit),
        cost_estimate=cost,
    )(Xt, adj_p, w1x, w1c, params["b1"], params["gamma"], params["beta"],
      params["w2"], params["b2"])
    return out[:B]


# ---------------------------- pure-JAX reference ----------------------------
# Uses the ORIGINAL formulation (explicit powers a2..a6, diag extraction,
# matvecs) so the symmetric-adjacency algebra in the kernel is verified.
def _mm(a, b):
    return jnp.matmul(a, b, precision=_HI)


def _kcycles_ref(adj):
    a = adj
    d = a.sum(-1)
    a2 = _mm(a, a); a3 = _mm(a2, a); a4 = _mm(a3, a); a5 = _mm(a4, a); a6 = _mm(a5, a)
    dg = lambda m: jnp.diagonal(m, axis1=-2, axis2=-1)
    d2, d3, d4, d5, d6 = dg(a2), dg(a3), dg(a4), dg(a5), dg(a6)
    k3 = d3.sum(-1) / 6.0
    c4 = d4 - d * (d - 1.0) - jnp.einsum("bij,bj->bi", a, d, precision=_HI)
    k4 = c4.sum(-1) / 8.0
    c5 = d5 - 2.0 * d3 * d - jnp.einsum("bij,bj->bi", a, d3, precision=_HI) + d3
    k5 = c5.sum(-1) / 10.0
    t1 = d6.sum(-1); t2 = (d3 ** 2).sum(-1); t3 = (a * a2 ** 2).sum((-2, -1))
    t4 = d4.sum(-1); t5 = (a2 ** 2).sum((-2, -1)); t6 = d3.sum(-1)
    t7 = (d2 ** 3).sum(-1); t8 = a3.sum((-2, -1)); t9 = (d2 ** 2).sum(-1); t10 = d2.sum(-1)
    k6 = (t1 - 3 * t2 + 9 * t3 - 6 * t4 + 6 * t5 - 4 * t6
          + 4 * t7 + 3 * t8 - 12 * t9 + 12 * t10) / 12.0
    return jnp.stack([k3, k4, k5, k6], axis=-1)


def readout_reference(X, adj, params):
    mean = X.mean(axis=1, keepdims=True)
    var = ((X - mean) ** 2).mean(axis=1, keepdims=True)
    xn = (X - mean) * lax.rsqrt(var + EPS)
    xr = jnp.maximum(xn, 0.0)
    xs = xr.sum(axis=1)                                   # (B, F)
    feats = jnp.concatenate([xs, _kcycles_ref(adj)], -1)  # (B, F+4)
    xl = _mm(feats, params["w1"]) + params["b1"]
    mu = xl.mean(-1, keepdims=True)
    v = ((xl - mu) ** 2).mean(-1, keepdims=True)
    xh = (xl - mu) * lax.rsqrt(v + EPS) * params["gamma"] + params["beta"]
    xt = jnp.maximum(xh, 0.0)
    return _mm(xt, params["w2"]) + params["b2"]


# ------------------------------- param init ---------------------------------
def init_params(key, in_dim, hidden_dim, out_dim):
    eff = in_dim + 4  # kc_flag adds 4 features
    k1, k2, k3, k4 = jax.random.split(key, 4)
    lim1 = 1.0 / math.sqrt(eff)
    lim2 = 1.0 / math.sqrt(hidden_dim)
    return dict(
        w1=jax.random.uniform(k1, (eff, hidden_dim), jnp.float32, -lim1, lim1),
        b1=jax.random.uniform(k2, (1, hidden_dim), jnp.float32, -lim1, lim1),
        gamma=jnp.ones((1, hidden_dim), jnp.float32),
        beta=jnp.zeros((1, hidden_dim), jnp.float32),
        w2=jax.random.uniform(k3, (hidden_dim, out_dim), jnp.float32, -lim2, lim2),
        b2=jax.random.uniform(k4, (1, out_dim), jnp.float32, -lim2, lim2),
    )


def _make_inputs(key, B, N, F):
    kx, ka = jax.random.split(key)
    X = jax.random.normal(kx, (B, N, F), jnp.float32)
    up = jnp.triu(jax.random.bernoulli(ka, 0.3, (B, N, N)).astype(jnp.float32), k=1)
    adj = up + jnp.swapaxes(up, -1, -2)   # symmetric 0/1, zero diagonal
    return X, adj


if __name__ == "__main__":
    key = jax.random.PRNGKey(0)
    k_small, k_big, kp1, kp2 = jax.random.split(key, 4)

    # --- small case (module-sized demo: B=2, N=16, F=4, H=32, O=1) ---
    B, N, F, H, O = 2, 16, 4, 32, 1
    X, adj = _make_inputs(k_small, B, N, F)
    params = init_params(kp1, F, H, O)
    out = discriminator_readout(X, adj, params)
    jax.block_until_ready(out)
    ref = readout_reference(X, adj, params)
    assert out.shape == (B, O)
    if not bool(jnp.allclose(out, ref, rtol=1e-3, atol=1e-3)):
        raise AssertionError(f"small-case mismatch: pallas={out} ref={ref}")

    # --- larger batch exercising G=8 graph blocking + batch padding ---
    B2, N2 = 10, 24
    X2, adj2 = _make_inputs(k_big, B2, N2, F)
    params2 = init_params(kp2, F, H, O)
    out2 = discriminator_readout(X2, adj2, params2)
    jax.block_until_ready(out2)
    ref2 = readout_reference(X2, adj2, params2)
    assert out2.shape == (B2, O)
    if not bool(jnp.allclose(out2, ref2, rtol=1e-3, atol=1e-3)):
        raise AssertionError(f"batched-case mismatch: pallas={out2} ref={ref2}")

    print("KERNEL_OK")
</pallas_src>

<mosaic_0001>
module attributes {stable_mosaic.version = 11 : i64} {
  func.func @_readout_kernel(%arg0: i32, %arg1: memref<2x4x16xf32, #tpu.memory_space<vmem>>, %arg2: memref<2x16x16xf32, #tpu.memory_space<vmem>>, %arg3: memref<4x32xf32, #tpu.memory_space<vmem>>, %arg4: memref<4x32xf32, #tpu.memory_space<vmem>>, %arg5: memref<1x32xf32, #tpu.memory_space<vmem>>, %arg6: memref<1x32xf32, #tpu.memory_space<vmem>>, %arg7: memref<1x32xf32, #tpu.memory_space<vmem>>, %arg8: memref<32x1xf32, #tpu.memory_space<vmem>>, %arg9: memref<1x1xf32, #tpu.memory_space<vmem>>, %arg10: memref<2x1xf32, #tpu.memory_space<vmem>>) attributes {dimension_semantics = [#tpu.dimension_semantics<parallel>], iteration_bounds = array<i64: 1>, scalar_prefetch = 0 : i64, scratch_operands = 0 : i64, tpu.core_type = #tpu.core_type<tc>, window_params = [{transform_indices = @transform_0, window_bounds = array<i64: 2, 4, 16>}, {transform_indices = @transform_1, window_bounds = array<i64: 2, 16, 16>}, {pipeline_mode = #tpu.pipeline_mode<synchronous>, transform_indices = @transform_2, window_bounds = array<i64: 4, 32>}, {pipeline_mode = #tpu.pipeline_mode<synchronous>, transform_indices = @transform_3, window_bounds = array<i64: 4, 32>}, {pipeline_mode = #tpu.pipeline_mode<synchronous>, transform_indices = @transform_4, window_bounds = array<i64: 1, 32>}, {pipeline_mode = #tpu.pipeline_mode<synchronous>, transform_indices = @transform_5, window_bounds = array<i64: 1, 32>}, {pipeline_mode = #tpu.pipeline_mode<synchronous>, transform_indices = @transform_6, window_bounds = array<i64: 1, 32>}, {pipeline_mode = #tpu.pipeline_mode<synchronous>, transform_indices = @transform_7, window_bounds = array<i64: 32, 1>}, {pipeline_mode = #tpu.pipeline_mode<synchronous>, transform_indices = @transform_8, window_bounds = array<i64: 1, 1>}, {transform_indices = @transform_9, window_bounds = array<i64: 2, 1>}]} {
    %c0 = arith.constant 0 : index
    %c0_0 = arith.constant 0 : index
    %c0_1 = arith.constant 0 : index
    %0 = vector.load %arg1[%c0, %c0_0, %c0_1] : memref<2x4x16xf32, #tpu.memory_space<vmem>>, vector<2x4x16xf32>
    %c0_2 = arith.constant 0 : index
    %c0_3 = arith.constant 0 : index
    %c0_4 = arith.constant 0 : index
    %1 = vector.load %arg2[%c0_2, %c0_3, %c0_4] : memref<2x16x16xf32, #tpu.memory_space<vmem>>, vector<2x16x16xf32>
    %cst = arith.constant dense<0.000000e+00> : vector<2x4xf32>
    %2 = vector.multi_reduction <add>, %0, %cst [2] : vector<2x4x16xf32> to vector<2x4xf32>
    %3 = vector.shape_cast %2 : vector<2x4xf32> to vector<2x4x1xf32>
    %cst_5 = arith.constant 1.600000e+01 : f32
    %4 = vector.broadcast %cst_5 : f32 to vector<2x4x1xf32>
    %5 = arith.divf %3, %4 : vector<2x4x1xf32>
    %6 = vector.broadcast %5 : vector<2x4x1xf32> to vector<2x4x16xf32>
    %7 = arith.subf %0, %6 : vector<2x4x16xf32>
    %8 = arith.mulf %7, %7 : vector<2x4x16xf32>
    %cst_6 = arith.constant dense<0.000000e+00> : vector<2x4xf32>
    %9 = vector.multi_reduction <add>, %8, %cst_6 [2] : vector<2x4x16xf32> to vector<2x4xf32>
    %10 = vector.shape_cast %9 : vector<2x4xf32> to vector<2x4x1xf32>
    %cst_7 = arith.constant 1.600000e+01 : f32
    %11 = vector.broadcast %cst_7 : f32 to vector<2x4x1xf32>
    %12 = arith.divf %10, %11 : vector<2x4x1xf32>
    %13 = vector.broadcast %5 : vector<2x4x1xf32> to vector<2x4x16xf32>
    %14 = arith.subf %0, %13 : vector<2x4x16xf32>
    %cst_8 = arith.constant 9.99999974E-6 : f32
    %15 = vector.broadcast %cst_8 : f32 to vector<2x4x1xf32>
    %16 = arith.addf %12, %15 : vector<2x4x1xf32>
    %17 = math.rsqrt %16 : vector<2x4x1xf32>
    %18 = vector.broadcast %17 : vector<2x4x1xf32> to vector<2x4x16xf32>
    %19 = arith.mulf %14, %18 : vector<2x4x16xf32>
    %cst_9 = arith.constant 0.000000e+00 : f32
    %20 = vector.broadcast %cst_9 : f32 to vector<2x4x16xf32>
    %21 = arith.maximumf %19, %20 : vector<2x4x16xf32>
    %cst_10 = arith.constant dense<0.000000e+00> : vector<2x4xf32>
    %22 = vector.multi_reduction <add>, %21, %cst_10 [2] : vector<2x4x16xf32> to vector<2x4xf32>
    %23 = arith.truncf %1 : vector<2x16x16xf32> to vector<2x16x16xbf16>
    "tpu.trace_start"() <{level = 10 : i32, message = "gij,gjk->gik"}> : () -> ()
    %cst_11 = arith.constant dense<0.000000e+00> : vector<2x16x16xf32>
    %24 = tpu.matmul %23, %23, %cst_11 {dimension_numbers = #tpu.dot_dimension_numbers<[2], [1], [1], [2], [0, 0, 0, 1, 1, 2], [0], [0]>} : vector<2x16x16xbf16>, vector<2x16x16xbf16>, vector<2x16x16xf32> -> vector<2x16x16xf32>
    "tpu.trace_stop"() : () -> ()
    %25 = arith.truncf %24 : vector<2x16x16xf32> to vector<2x16x16xbf16>
    "tpu.trace_start"() <{level = 10 : i32, message = "gij,gjk->gik"}> : () -> ()
    %cst_12 = arith.constant dense<0.000000e+00> : vector<2x16x16xf32>
    %26 = tpu.matmul %25, %23, %cst_12 {dimension_numbers = #tpu.dot_dimension_numbers<[2], [1], [1], [2], [0, 0, 0, 1, 1, 2], [0], [0]>} : vector<2x16x16xbf16>, vector<2x16x16xbf16>, vector<2x16x16xf32> -> vector<2x16x16xf32>
    "tpu.trace_stop"() : () -> ()
    %27 = arith.mulf %24, %24 : vector<2x16x16xf32>
    %cst_13 = arith.constant dense<0.000000e+00> : vector<2x16xf32>
    %28 = vector.multi_reduction <add>, %1, %cst_13 [2] : vector<2x16x16xf32> to vector<2x16xf32>
    %29 = arith.mulf %1, %1 : vector<2x16x16xf32>
    %cst_14 = arith.constant dense<0.000000e+00> : vector<2x16xf32>
    %30 = vector.multi_reduction <add>, %29, %cst_14 [2] : vector<2x16x16xf32> to vector<2x16xf32>
    %31 = arith.mulf %1, %24 : vector<2x16x16xf32>
    %cst_15 = arith.constant dense<0.000000e+00> : vector<2x16xf32>
    %32 = vector.multi_reduction <add>, %31, %cst_15 [2] : vector<2x16x16xf32> to vector<2x16xf32>
    %cst_16 = arith.constant dense<0.000000e+00> : vector<2x16xf32>
    %33 = vector.multi_reduction <add>, %27, %cst_16 [2] : vector<2x16x16xf32> to vector<2x16xf32>
    %34 = arith.mulf %24, %26 : vector<2x16x16xf32>
    %cst_17 = arith.constant dense<0.000000e+00> : vector<2x16xf32>
    %35 = vector.multi_reduction <add>, %34, %cst_17 [2] : vector<2x16x16xf32> to vector<2x16xf32>
    %36 = arith.mulf %26, %26 : vector<2x16x16xf32>
    %cst_18 = arith.constant dense<0.000000e+00> : vector<2x16xf32>
    %37 = vector.multi_reduction <add>, %36, %cst_18 [2] : vector<2x16x16xf32> to vector<2x16xf32>
    %cst_19 = arith.constant dense<0.000000e+00> : vector<2xf32>
    %38 = vector.multi_reduction <add>, %28, %cst_19 [1] : vector<2x16xf32> to vector<2xf32>
    %39 = vector.shape_cast %38 : vector<2xf32> to vector<2x1xf32>
    %40 = arith.mulf %28, %28 : vector<2x16xf32>
    %cst_20 = arith.constant dense<0.000000e+00> : vector<2xf32>
    %41 = vector.multi_reduction <add>, %40, %cst_20 [1] : vector<2x16xf32> to vector<2xf32>
    %42 = vector.shape_cast %41 : vector<2xf32> to vector<2x1xf32>
    %cst_21 = arith.constant dense<0.000000e+00> : vector<2xf32>
    %43 = vector.multi_reduction <add>, %32, %cst_21 [1] : vector<2x16xf32> to vector<2xf32>
    %44 = vector.shape_cast %43 : vector<2xf32> to vector<2x1xf32>
    %cst_22 = arith.constant dense<0.000000e+00> : vector<2xf32>
    %45 = vector.multi_reduction <add>, %33, %cst_22 [1] : vector<2x16xf32> to vector<2xf32>
    %46 = vector.shape_cast %45 : vector<2xf32> to vector<2x1xf32>
    %cst_23 = arith.constant dense<0.000000e+00> : vector<2xf32>
    %47 = vector.multi_reduction <add>, %35, %cst_23 [1] : vector<2x16xf32> to vector<2xf32>
    %48 = vector.shape_cast %47 : vector<2xf32> to vector<2x1xf32>
    %cst_24 = arith.constant dense<0.000000e+00> : vector<2xf32>
    %49 = vector.multi_reduction <add>, %37, %cst_24 [1] : vector<2x16xf32> to vector<2xf32>
    %50 = vector.shape_cast %49 : vector<2xf32> to vector<2x1xf32>
    %51 = arith.mulf %32, %28 : vector<2x16xf32>
    %cst_25 = arith.constant dense<0.000000e+00> : vector<2xf32>
    %52 = vector.multi_reduction <add>, %51, %cst_25 [1] : vector<2x16xf32> to vector<2xf32>
    %53 = vector.shape_cast %52 : vector<2xf32> to vector<2x1xf32>
    %cst_26 = arith.constant 6.000000e+00 : f32
    %54 = vector.broadcast %cst_26 : f32 to vector<2x1xf32>
    %55 = arith.divf %44, %54 : vector<2x1xf32>
    %cst_27 = arith.constant 2.000000e+00 : f32
    %56 = vector.broadcast %cst_27 : f32 to vector<2x1xf32>
    %57 = arith.mulf %56, %42 : vector<2x1xf32>
    %58 = arith.subf %46, %57 : vector<2x1xf32>
    %59 = arith.addf %58, %39 : vector<2x1xf32>
    %cst_28 = arith.constant 8.000000e+00 : f32
    %60 = vector.broadcast %cst_28 : f32 to vector<2x1xf32>
    %61 = arith.divf %59, %60 : vector<2x1xf32>
    %cst_29 = arith.constant 3.000000e+00 : f32
    %62 = vector.broadcast %cst_29 : f32 to vector<2x1xf32>
    %63 = arith.mulf %62, %53 : vector<2x1xf32>
    %64 = arith.subf %48, %63 : vector<2x1xf32>
    %65 = arith.addf %64, %44 : vector<2x1xf32>
    %cst_30 = arith.constant 1.000000e+01 : f32
    %66 = vector.broadcast %cst_30 : f32 to vector<2x1xf32>
    %67 = arith.divf %65, %66 : vector<2x1xf32>
    %68 = arith.mulf %32, %32 : vector<2x16xf32>
    %cst_31 = arith.constant dense<0.000000e+00> : vector<2xf32>
    %69 = vector.multi_reduction <add>, %68, %cst_31 [1] : vector<2x16xf32> to vector<2xf32>
    %70 = vector.shape_cast %69 : vector<2xf32> to vector<2x1xf32>
    %71 = arith.mulf %1, %27 : vector<2x16x16xf32>
    %cst_32 = arith.constant dense<0.000000e+00> : vector<2x16xf32>
    %72 = vector.multi_reduction <add>, %71, %cst_32 [2] : vector<2x16x16xf32> to vector<2x16xf32>
    %cst_33 = arith.constant dense<0.000000e+00> : vector<2xf32>
    %73 = vector.multi_reduction <add>, %72, %cst_33 [1] : vector<2x16xf32> to vector<2xf32>
    %74 = vector.shape_cast %73 : vector<2xf32> to vector<2x1xf32>
    %75 = arith.mulf %30, %30 : vector<2x16xf32>
    %76 = arith.mulf %30, %75 : vector<2x16xf32>
    %cst_34 = arith.constant dense<0.000000e+00> : vector<2xf32>
    %77 = vector.multi_reduction <add>, %76, %cst_34 [1] : vector<2x16xf32> to vector<2xf32>
    %78 = vector.shape_cast %77 : vector<2xf32> to vector<2x1xf32>
    %cst_35 = arith.constant dense<0.000000e+00> : vector<2x16xf32>
    %79 = vector.multi_reduction <add>, %26, %cst_35 [2] : vector<2x16x16xf32> to vector<2x16xf32>
    %cst_36 = arith.constant dense<0.000000e+00> : vector<2xf32>
    %80 = vector.multi_reduction <add>, %79, %cst_36 [1] : vector<2x16xf32> to vector<2xf32>
    %81 = vector.shape_cast %80 : vector<2xf32> to vector<2x1xf32>
    %82 = arith.mulf %30, %30 : vector<2x16xf32>
    %cst_37 = arith.constant dense<0.000000e+00> : vector<2xf32>
    %83 = vector.multi_reduction <add>, %82, %cst_37 [1] : vector<2x16xf32> to vector<2xf32>
    %84 = vector.shape_cast %83 : vector<2xf32> to vector<2x1xf32>
    %cst_38 = arith.constant dense<0.000000e+00> : vector<2xf32>
    %85 = vector.multi_reduction <add>, %30, %cst_38 [1] : vector<2x16xf32> to vector<2xf32>
    %86 = vector.shape_cast %85 : vector<2xf32> to vector<2x1xf32>
    %cst_39 = arith.constant 3.000000e+00 : f32
    %87 = vector.broadcast %cst_39 : f32 to vector<2x1xf32>
    %88 = arith.mulf %87, %70 : vector<2x1xf32>
    %89 = arith.subf %50, %88 : vector<2x1xf32>
    %cst_40 = arith.constant 9.000000e+00 : f32
    %90 = vector.broadcast %cst_40 : f32 to vector<2x1xf32>
    %91 = arith.mulf %90, %74 : vector<2x1xf32>
    %92 = arith.addf %89, %91 : vector<2x1xf32>
    %cst_41 = arith.constant 6.000000e+00 : f32
    %93 = vector.broadcast %cst_41 : f32 to vector<2x1xf32>
    %94 = arith.mulf %93, %46 : vector<2x1xf32>
    %95 = arith.subf %92, %94 : vector<2x1xf32>
    %cst_42 = arith.constant 6.000000e+00 : f32
    %96 = vector.broadcast %cst_42 : f32 to vector<2x1xf32>
    %97 = arith.mulf %96, %46 : vector<2x1xf32>
    %98 = arith.addf %95, %97 : vector<2x1xf32>
    %cst_43 = arith.constant 4.000000e+00 : f32
    %99 = vector.broadcast %cst_43 : f32 to vector<2x1xf32>
    %100 = arith.mulf %99, %44 : vector<2x1xf32>
    %101 = arith.subf %98, %100 : vector<2x1xf32>
    %cst_44 = arith.constant 4.000000e+00 : f32
    %102 = vector.broadcast %cst_44 : f32 to vector<2x1xf32>
    %103 = arith.mulf %102, %78 : vector<2x1xf32>
    %104 = arith.addf %101, %103 : vector<2x1xf32>
    %cst_45 = arith.constant 3.000000e+00 : f32
    %105 = vector.broadcast %cst_45 : f32 to vector<2x1xf32>
    %106 = arith.mulf %105, %81 : vector<2x1xf32>
    %107 = arith.addf %104, %106 : vector<2x1xf32>
    %cst_46 = arith.constant 1.200000e+01 : f32
    %108 = vector.broadcast %cst_46 : f32 to vector<2x1xf32>
    %109 = arith.mulf %108, %84 : vector<2x1xf32>
    %110 = arith.subf %107, %109 : vector<2x1xf32>
    %cst_47 = arith.constant 1.200000e+01 : f32
    %111 = vector.broadcast %cst_47 : f32 to vector<2x1xf32>
    %112 = arith.mulf %111, %86 : vector<2x1xf32>
    %113 = arith.addf %110, %112 : vector<2x1xf32>
    %cst_48 = arith.constant 1.200000e+01 : f32
    %114 = vector.broadcast %cst_48 : f32 to vector<2x1xf32>
    %115 = arith.divf %113, %114 : vector<2x1xf32>
    %c0_49 = arith.constant 0 : index
    %c0_50 = arith.constant 0 : index
    %116 = vector.load %arg3[%c0_49, %c0_50] : memref<4x32xf32, #tpu.memory_space<vmem>>, vector<4x32xf32>
    %cst_51 = arith.constant dense<0.000000e+00> : vector<2x32xf32>
    %117 = tpu.matmul %22, %116, %cst_51 {dimension_numbers = #tpu.dot_dimension_numbers<[1], [0], [0], [1], [0, 0, 1, 1], [], []>} : vector<2x4xf32>, vector<4x32xf32>, vector<2x32xf32> -> vector<2x32xf32>
    %c0_52 = arith.constant 0 : index
    %c0_53 = arith.constant 0 : index
    %118 = vector.load %arg4[%c0_52, %c0_53] : memref<4x32xf32, #tpu.memory_space<vmem>>, vector<1x32xf32>
    %119 = vector.broadcast %55 : vector<2x1xf32> to vector<2x32xf32>
    %120 = vector.broadcast %118 : vector<1x32xf32> to vector<2x32xf32>
    %121 = arith.mulf %119, %120 : vector<2x32xf32>
    %122 = arith.addf %117, %121 : vector<2x32xf32>
    %c1 = arith.constant 1 : index
    %c0_54 = arith.constant 0 : index
    %123 = vector.load %arg4[%c1, %c0_54] : memref<4x32xf32, #tpu.memory_space<vmem>>, vector<1x32xf32>
    %124 = vector.broadcast %61 : vector<2x1xf32> to vector<2x32xf32>
    %125 = vector.broadcast %123 : vector<1x32xf32> to vector<2x32xf32>
    %126 = arith.mulf %124, %125 : vector<2x32xf32>
    %127 = arith.addf %122, %126 : vector<2x32xf32>
    %c2 = arith.constant 2 : index
    %c0_55 = arith.constant 0 : index
    %128 = vector.load %arg4[%c2, %c0_55] : memref<4x32xf32, #tpu.memory_space<vmem>>, vector<1x32xf32>
    %129 = vector.broadcast %67 : vector<2x1xf32> to vector<2x32xf32>
    %130 = vector.broadcast %128 : vector<1x32xf32> to vector<2x32xf32>
    %131 = arith.mulf %129, %130 : vector<2x32xf32>
    %132 = arith.addf %127, %131 : vector<2x32xf32>
    %c3 = arith.constant 3 : index
    %c0_56 = arith.constant 0 : index
    %133 = vector.load %arg4[%c3, %c0_56] : memref<4x32xf32, #tpu.memory_space<vmem>>, vector<1x32xf32>
    %134 = vector.broadcast %115 : vector<2x1xf32> to vector<2x32xf32>
    %135 = vector.broadcast %133 : vector<1x32xf32> to vector<2x32xf32>
    %136 = arith.mulf %134, %135 : vector<2x32xf32>
    %137 = arith.addf %132, %136 : vector<2x32xf32>
    %c0_57 = arith.constant 0 : index
    %c0_58 = arith.constant 0 : index
    %138 = vector.load %arg5[%c0_57, %c0_58] : memref<1x32xf32, #tpu.memory_space<vmem>>, vector<1x32xf32>
    %139 = vector.broadcast %138 : vector<1x32xf32> to vector<2x32xf32>
    %140 = arith.addf %137, %139 : vector<2x32xf32>
    %cst_59 = arith.constant dense<0.000000e+00> : vector<2xf32>
    %141 = vector.multi_reduction <add>, %140, %cst_59 [1] : vector<2x32xf32> to vector<2xf32>
    %142 = vector.shape_cast %141 : vector<2xf32> to vector<2x1xf32>
    %cst_60 = arith.constant 3.200000e+01 : f32
    %143 = vector.broadcast %cst_60 : f32 to vector<2x1xf32>
    %144 = arith.divf %142, %143 : vector<2x1xf32>
    %145 = vector.broadcast %144 : vector<2x1xf32> to vector<2x32xf32>
    %146 = arith.subf %140, %145 : vector<2x32xf32>
    %147 = arith.mulf %146, %146 : vector<2x32xf32>
    %cst_61 = arith.constant dense<0.000000e+00> : vector<2xf32>
    %148 = vector.multi_reduction <add>, %147, %cst_61 [1] : vector<2x32xf32> to vector<2xf32>
    %149 = vector.shape_cast %148 : vector<2xf32> to vector<2x1xf32>
    %cst_62 = arith.constant 3.200000e+01 : f32
    %150 = vector.broadcast %cst_62 : f32 to vector<2x1xf32>
    %151 = arith.divf %149, %150 : vector<2x1xf32>
    %152 = vector.broadcast %144 : vector<2x1xf32> to vector<2x32xf32>
    %153 = arith.subf %140, %152 : vector<2x32xf32>
    %cst_63 = arith.constant 9.99999974E-6 : f32
    %154 = vector.broadcast %cst_63 : f32 to vector<2x1xf32>
    %155 = arith.addf %151, %154 : vector<2x1xf32>
    %156 = math.rsqrt %155 : vector<2x1xf32>
    %157 = vector.broadcast %156 : vector<2x1xf32> to vector<2x32xf32>
    %158 = arith.mulf %153, %157 : vector<2x32xf32>
    %c0_64 = arith.constant 0 : index
    %c0_65 = arith.constant 0 : index
    %159 = vector.load %arg6[%c0_64, %c0_65] : memref<1x32xf32, #tpu.memory_space<vmem>>, vector<1x32xf32>
    %160 = vector.broadcast %159 : vector<1x32xf32> to vector<2x32xf32>
    %161 = arith.mulf %158, %160 : vector<2x32xf32>
    %c0_66 = arith.constant 0 : index
    %c0_67 = arith.constant 0 : index
    %162 = vector.load %arg7[%c0_66, %c0_67] : memref<1x32xf32, #tpu.memory_space<vmem>>, vector<1x32xf32>
    %163 = vector.broadcast %162 : vector<1x32xf32> to vector<2x32xf32>
    %164 = arith.addf %161, %163 : vector<2x32xf32>
    %cst_68 = arith.constant 0.000000e+00 : f32
    %165 = vector.broadcast %cst_68 : f32 to vector<2x32xf32>
    %166 = arith.maximumf %164, %165 : vector<2x32xf32>
    %c0_69 = arith.constant 0 : index
    %c0_70 = arith.constant 0 : index
    %167 = vector.load %arg8[%c0_69, %c0_70] : memref<32x1xf32, #tpu.memory_space<vmem>>, vector<32x1xf32>
    %cst_71 = arith.constant dense<0.000000e+00> : vector<2x1xf32>
    %168 = tpu.matmul %166, %167, %cst_71 {dimension_numbers = #tpu.dot_dimension_numbers<[1], [0], [0], [1], [0, 0, 1, 1], [], []>} : vector<2x32xf32>, vector<32x1xf32>, vector<2x1xf32> -> vector<2x1xf32>
    %c0_72 = arith.constant 0 : index
    %c0_73 = arith.constant 0 : index
    %169 = vector.load %arg9[%c0_72, %c0_73] : memref<1x1xf32, #tpu.memory_space<vmem>>, vector<1x1xf32>
    %170 = vector.broadcast %169 : vector<1x1xf32> to vector<2x1xf32>
    %171 = arith.addf %168, %170 : vector<2x1xf32>
    %c0_74 = arith.constant 0 : index
    %c0_75 = arith.constant 0 : index
    %172 = vector.load %arg10[%c0_74, %c0_75] : memref<2x1xf32, #tpu.memory_space<vmem>>, vector<2x1xf32>
    tpu.vector_store %arg10[%c0_74, %c0_75], %171 {strides = array<i32>} : memref<2x1xf32, #tpu.memory_space<vmem>>, vector<2x1xf32>,
    return
  }
  func.func @transform_0(%arg0: i32) -> (i32, i32, i32) {
    %c0_i32 = arith.constant 0 : i32
    %c0_i32_0 = arith.constant 0 : i32
    %c0_i32_1 = arith.constant 0 : i32
    return %arg0, %c0_i32, %c0_i32_0 : i32, i32, i32
  }
  func.func @transform_1(%arg0: i32) -> (i32, i32, i32) {
    %c0_i32 = arith.constant 0 : i32
    %c0_i32_0 = arith.constant 0 : i32
    %c0_i32_1 = arith.constant 0 : i32
    return %arg0, %c0_i32, %c0_i32_0 : i32, i32, i32
  }
  func.func @transform_2(%arg0: i32) -> (i32, i32) {
    %c0_i32 = arith.constant 0 : i32
    %c0_i32_0 = arith.constant 0 : i32
    %c0_i32_1 = arith.constant 0 : i32
    return %c0_i32, %c0_i32_0 : i32, i32
  }
  func.func @transform_3(%arg0: i32) -> (i32, i32) {
    %c0_i32 = arith.constant 0 : i32
    %c0_i32_0 = arith.constant 0 : i32
    %c0_i32_1 = arith.constant 0 : i32
    return %c0_i32, %c0_i32_0 : i32, i32
  }
  func.func @transform_4(%arg0: i32) -> (i32, i32) {
    %c0_i32 = arith.constant 0 : i32
    %c0_i32_0 = arith.constant 0 : i32
    %c0_i32_1 = arith.constant 0 : i32
    return %c0_i32, %c0_i32_0 : i32, i32
  }
  func.func @transform_5(%arg0: i32) -> (i32, i32) {
    %c0_i32 = arith.constant 0 : i32
    %c0_i32_0 = arith.constant 0 : i32
    %c0_i32_1 = arith.constant 0 : i32
    return %c0_i32, %c0_i32_0 : i32, i32
  }
  func.func @transform_6(%arg0: i32) -> (i32, i32) {
    %c0_i32 = arith.constant 0 : i32
    %c0_i32_0 = arith.constant 0 : i32
    %c0_i32_1 = arith.constant 0 : i32
    return %c0_i32, %c0_i32_0 : i32, i32
  }
  func.func @transform_7(%arg0: i32) -> (i32, i32) {
    %c0_i32 = arith.constant 0 : i32
    %c0_i32_0 = arith.constant 0 : i32
    %c0_i32_1 = arith.constant 0 : i32
    return %c0_i32, %c0_i32_0 : i32, i32
  }
  func.func @transform_8(%arg0: i32) -> (i32, i32) {
    %c0_i32 = arith.constant 0 : i32
    %c0_i32_0 = arith.constant 0 : i32
    %c0_i32_1 = arith.constant 0 : i32
    return %c0_i32, %c0_i32_0 : i32, i32
  }
  func.func @transform_9(%arg0: i32) -> (i32, i32) {
    %c0_i32 = arith.constant 0 : i32
    %c0_i32_0 = arith.constant 0 : i32
    return %arg0, %c0_i32 : i32, i32
  }
}

</mosaic_0001>

<bundles_post_ra>
// kernel: tpu_custom_call.1
= control target key start
LH: loop header
LB: loop body
LE: loop exit
PB: predicated region body
PF: predicated region fallthrough
CT: control target
= control target key end

     0   :  { %vm41_vm0 = vcmask 125952   ;;  %v1118_v0 = vmov 0.0   ;;  %vm1119_vm1 = vmmov 0   ;;  %vm79_vm2 = vcmask 130048   ;;  %s1486_s0 = inlined_call_operand.vmem [shape: f32[2,4,16], index: 0, kind: input, shape index: {}]   ;;  %s1487_s1 = inlined_call_operand.vmem [shape: f32[2,16,16], index: 1, kind: input, shape index: {}]   ;;  %s1488_s2 = inlined_call_operand.vmem [shape: f32[4,32], index: 2, kind: input, shape index: {}]   ;;  %s1489_s3 = inlined_call_operand.vmem [shape: f32[4,32], index: 3, kind: input, shape index: {}]   ;;  %s1490_s4 = inlined_call_operand.vmem [shape: f32[1,32], index: 4, kind: input, shape index: {}]   ;;  %s1491_s7 = inlined_call_operand.vmem [shape: f32[32,1], index: 7, kind: input, shape index: {}]   ;;  %s1492_s8 = inlined_call_operand.<no memory space> [shape: f32[1,1], index: 8, kind: input, shape index: {}]   ;;  %s1493_s5 = inlined_call_operand.vmem [shape: f32[1,32], index: 5, kind: input, shape index: {}]   ;;  %s1494_s6 = inlined_call_operand.vmem [shape: f32[1,32], index: 6, kind: input, shape index: {}]   ;;  %s1495_s9 = inlined_call_operand.vmem [shape: f32[2,1], index: 9, kind: output, shape index: {}]  }
   0x1   :  { %1063 = vmatprep.subr.bf16.mxu0 %v1118_v0  ;;  %1069 = vmatprep.subr.bf16.mxu1 %v1118_v0  ;;  %v35_v1 = vld [vmem:[%s1486_s0] sm:$0xf]  ;;  %v1182_v3 = vld [vmem:[%s1487_s1 + $0x8] sm:$0xff]  ;;  %v1190_v6 = vld [vmem:[%s1487_s1 + $0x10] sm:$0xff]  ;;  %vm807_vm3 = vcmask 1043456   ;;  %vm376_vm4 = vcmask 1041409  }
   0x2   :  { %v1177_v2 = vld [vmem:[%s1487_s1] sm:$0xff]  ;;  %v42_v4 = vsel %vm41_vm0, %v35_v1, 0.0  ;;  %v1195_v7 = vld [vmem:[%s1487_s1 + $0x18] sm:$0xff]  ;;  %1065 = vmatprep.mubr.msk.bf16.mxu0 %vm1119_vm1, %v1118_v0  ;;  %1071 = vmatprep.mubr.msk.bf16.mxu1 %vm1119_vm1, %v1118_v0  ;;  %vm804_vm5 = vcmask 31744   ;;  %vm365_vm6 = vcmask 130112   ;;  %vm379_vm7 = vcmask 123904  }
   0x3   :  { %v77_v5 = vpack.c.bf16 %v1182_v3, %v1177_v2  ;;  %v36_v8 = vld [vmem:[%s1486_s0 + $0x4] sm:$0xf]  ;;  %43 = vadd.xlane.f32.xlu0 %v42_v4  ;;  %v78_v9 = vpack.c.bf16 %v1195_v7, %v1190_v6  ;;  %v274_v4 = vmul.f32 %v1177_v2, %v1177_v2  ;;  %vm910_vm8 = vcmask 254976  }
   0x4   :  { %v45_v10 = vsel %vm41_vm0, %v36_v8, 0.0  ;;  %vm953_vm9 = vcmask 261120   ;;  %vm1027_vm10 = vcmask 1024  }
   0x5   :  { %1064 = vmatpush3.bf16.msra.mxu0 %v77_v5  ;;  %1070 = vmatpush3.bf16.msra.mxu1 %v78_v9 }
   0x6   :  { %1075 = vmatprep.subr.bf16.mxu0 %v1118_v0  ;;  %1081 = vmatprep.subr.bf16.mxu1 %v1118_v0 }
   0x7   :  { %46 = vadd.xlane.f32.xlu0 %v45_v10  ;;  %v278_v10 = vsel %vm79_vm2, %v274_v4, 0.0 }
   0x8   :  { %1066 = vmatmul.mubr.msk.bf16.vlgmr.msra.gmra.mrb[0].mxu0 %vm79_vm2, %v77_v5  ;;  %1072 = vmatmul.mubr.msk.bf16.vlgmr.msra.gmra.mrb[0].mxu1 %vm79_vm2, %v78_v9 }
   0x9   :  { %1076 = vmatpush3.bf16.msra.mxu0 %v77_v5  ;;  %1082 = vmatpush3.bf16.msra.mxu1 %v78_v9  ;;  %v786_v5 = vld [vmem:[%s1488_s2] sm:$0xf] }
   0xa   :  { %1077 = vmatprep.mubr.msk.bf16.mxu0 %vm1119_vm1, %v1118_v0  ;;  %1083 = vmatprep.mubr.msk.bf16.mxu1 %vm1119_vm1, %v1118_v0 }
   0xb   :  { %1087 = vmatprep.subr.mxu0 %v1118_v0 }
  0x90   :  { %v44_v11 = vpop.xlane.xlu0 %43 }
  0x91   :  { %v49_v12 = vmul.f32 0.0625, %v44_v11  ;;  %v276_v11 = vmul.f32 %v1190_v6, %v1190_v6 }
  0x93   :  { %v51_v13 = vsub.f32 %v35_v1, %v49_v12  ;;  %v275_v12 = vmul.f32 %v1182_v3, %v1182_v3 }
  0x94   :  { %v47_v14 = vpop.xlane.xlu0 %46 }
  0x95   :  { %v50_v15 = vmul.f32 0.0625, %v47_v14  ;;  %v53_v16 = vmul.f32 %v51_v13, %v51_v13  ;;  %v284_v14 = vsel %vm79_vm2, %v276_v11, 0.0 }
  0x97   :  { %v52_v17 = vsub.f32 %v36_v8, %v50_v15  ;;  %v55_v18 = vsel %vm41_vm0, %v53_v16, 0.0  ;;  %v281_v15 = vsel %vm79_vm2, %v275_v12, 0.0  ;;  %v277_v16 = vmul.f32 %v1195_v7, %v1195_v7 }
  0x98   :  { %56 = vadd.xlane.f32.xlu1 %v55_v18 }
  0x99   :  { %v54_v19 = vmul.f32 %v52_v17, %v52_v17  ;;  %v287_v18 = vsel %vm79_vm2, %v277_v16, 0.0 }
  0x9b   :  { %v58_v20 = vsel %vm41_vm0, %v54_v19, 0.0  ;;  %v268_v19 = vsel %vm79_vm2, %v1190_v6, 0.0 }
  0x9c   :  { %59 = vadd.xlane.f32.xlu1 %v58_v20  ;;  %v265_v20 = vsel %vm79_vm2, %v1182_v3, 0.0 }
  0xdb   :  { %v1211_v21 = vpop.f32.mrb[0].mxu0  ;;  %v1213_v22 = vpop.f32.mrb[0].mxu1 }
  0xdc   :  { %v1067_v23 = vpop.f32.mrb[1].mxu0  ;;  %v1073_v24 = vpop.f32.mrb[1].mxu1  ;;  %v290_v42 = vmul.f32 %v1211_v21, %v1177_v2  ;;  %v258_v45 = vmul.f32 %v1211_v21, %v1211_v21  ;;  %v292_v48 = vmul.f32 %v1213_v22, %v1190_v6  ;;  %v260_v51 = vmul.f32 %v1213_v22, %v1213_v22 }
  0xdd   :  { %v1215_v25 = vpop.f32.mrb[2].mxu0  ;;  %v1219_v27 = vpop.f32.mrb[2].mxu1  ;;  %v271_v23 = vsel %vm79_vm2, %v1195_v7, 0.0 }
  0xde   :  { %v168_v26 = vpack.c.bf16 %v1215_v25, %v1211_v21  ;;  %v1068_v28 = vpop.f32.mrb[3].mxu0  ;;  %v169_v29 = vpack.c.bf16 %v1219_v27, %v1213_v22  ;;  %v1074_v30 = vpop.f32.mrb[3].mxu1  ;;  %v294_v46 = vsel %vm79_vm2, %v290_v42, 0.0  ;;  %v291_v49 = vmul.f32 %v1215_v25, %v1182_v3 }
  0xdf   :  { %v596_v50 = vmul.f32 %v258_v45, %v1177_v2  ;;  %v300_v52 = vsel %vm79_vm2, %v292_v48, 0.0  ;;  %v293_v54 = vmul.f32 %v1219_v27, %v1195_v7  ;;  %v259_v55 = vmul.f32 %v1215_v25, %v1215_v25 }
  0xe0   :  { %1078 = vmatmul.mubr.msk.bf16.vlgmr.msra.gmra.mrb[4].mxu0 %vm79_vm2, %v168_v26  ;;  %1084 = vmatmul.mubr.msk.bf16.vlgmr.msra.gmra.mrb[4].mxu1 %vm79_vm2, %v169_v29  ;;  %v297_v53 = vsel %vm79_vm2, %v291_v49, 0.0  ;;  %v598_v56 = vmul.f32 %v260_v51, %v1190_v6  ;;  %v261_v60 = vmul.f32 %v1219_v27, %v1219_v27  ;;  %v312_v8 = vsel %vm79_vm2, %v260_v51, 0.0 }
  0xe1   :  { %1089 = vmatprep.mubr.msk.f32.mxu0 %vm1119_vm1, %v1118_v0  ;;  %1100 = vmatprep.mubr.msk.f32.mxu1 %vm1119_vm1, %v1118_v0  ;;  %v600_v57 = vsel %vm79_vm2, %v596_v50, 0.0  ;;  %v303_v58 = vsel %vm79_vm2, %v293_v54, 0.0  ;;  %v597_v59 = vmul.f32 %v259_v55, %v1182_v3  ;;  %v306_v0 = vsel %vm79_vm2, %v258_v45, 0.0 }
  0xe2   :  { %v606_v61 = vsel %vm79_vm2, %v598_v56, 0.0  ;;  %v599_v63 = vmul.f32 %v261_v60, %v1195_v7  ;;  %1088 = vmatpush3.msk.msra.mxu0 %vm807_vm3, %v786_v5  ;;  %v309_v9 = vsel %vm79_vm2, %v259_v55, 0.0 }
  0xe3   :  { %v603_v62 = vsel %vm79_vm2, %v597_v59, 0.0 }
  0xe4   :  { %v609_v1 = vsel %vm79_vm2, %v599_v63, 0.0 }
 0x125   :  { %v57_v31 = vpop.xlane.xlu1 %56 }
 0x126   :  { %v61_v32 = vmul.f32 0.0625, %v57_v31 }
 0x128   :  { %v63_v33 = vadd.f32 1e-05, %v61_v32 }
 0x129   :  { %v60_v34 = vpop.xlane.xlu1 %59 }
 0x12a   :  { %1112 = vrsqrt.f32 %v63_v33  ;;  %v62_v35 = vmul.f32 0.0625, %v60_v34 }
 0x12c   :  { %v64_v36 = vadd.f32 1e-05, %v62_v35 }
 0x12e   :  { %1114 = vrsqrt.f32 %v64_v36 }
 0x134   :  { %v1113_v37 = vpop.eup %1112 }
 0x135   :  { %v67_v38 = vmul.f32 %v1113_v37, %v51_v13  ;;  %v315_v13 = vsel %vm79_vm2, %v261_v60, 0.0 }
 0x137   :  { %v69_v39 = vmax.f32 %v67_v38, 0.0 }
 0x138   :  { %v1115_v40 = vpop.eup %1114 }
 0x139   :  { %v71_v41 = vsel %vm41_vm0, %v69_v39, 0.0  ;;  %v68_v43 = vmul.f32 %v1115_v40, %v52_v17  ;;  %v262_v17 = vsel %vm79_vm2, %v1177_v2, 0.0 }
 0x13a   :  { %72 = vadd.xlane.f32.xlu0 %v71_v41 }
 0x13b   :  { %v70_v44 = vmax.f32 %v68_v43, 0.0 }
 0x13d   :  { %v74_v47 = vsel %vm41_vm0, %v70_v44, 0.0 }
 0x13e   :  { %295 = vadd.xlane.f32.xlu0 %v294_v46  ;;  %75 = vadd.xlane.f32.xlu1 %v74_v47 }
 0x142   :  { %301 = vadd.xlane.f32.xlu0 %v300_v52  ;;  %298 = vadd.xlane.f32.xlu1 %v297_v53 }
 0x146   :  { %601 = vadd.xlane.f32.xlu0 %v600_v57  ;;  %304 = vadd.xlane.f32.xlu1 %v303_v58 }
 0x14a   :  { %607 = vadd.xlane.f32.xlu0 %v606_v61  ;;  %604 = vadd.xlane.f32.xlu1 %v603_v62 }
 0x14e   :  { %307 = vadd.xlane.f32.xlu0 %v306_v0  ;;  %610 = vadd.xlane.f32.xlu1 %v609_v1 }
 0x152   :  { %313 = vadd.xlane.f32.xlu0 %v312_v8  ;;  %310 = vadd.xlane.f32.xlu1 %v309_v9 }
 0x156   :  { %279 = vadd.xlane.f32.xlu0 %v278_v10  ;;  %316 = vadd.xlane.f32.xlu1 %v315_v13 }
 0x15a   :  { %285 = vadd.xlane.f32.xlu0 %v284_v14  ;;  %282 = vadd.xlane.f32.xlu1 %v281_v15 }
 0x15e   :  { %263 = vadd.xlane.f32.xlu0 %v262_v17  ;;  %288 = vadd.xlane.f32.xlu1 %v287_v18 }
 0x162   :  { %269 = vadd.xlane.f32.xlu0 %v268_v19  ;;  %266 = vadd.xlane.f32.xlu1 %v265_v20 }
 0x166   :  { %272 = vadd.xlane.f32.xlu1 %v271_v23 }
 0x1b3   :  { %v207_v24 = vpop.f32.mrb[4].mxu0  ;;  %v251_v26 = vpop.f32.mrb[4].mxu1 }
 0x1b4   :  { %v1079_v28 = vpop.f32.mrb[5].mxu0  ;;  %v674_v2 = vsel %vm79_vm2, %v207_v24, 0.0  ;;  %v334_v29 = vmul.f32 %v207_v24, %v207_v24  ;;  %v318_v30 = vmul.f32 %v207_v24, %v1211_v21  ;;  %v1085_v31 = vpop.f32.mrb[5].mxu1  ;;  %v320_v6 = vmul.f32 %v251_v26, %v1213_v22 }
 0x1b5   :  { %v210_v32 = vpop.f32.mrb[6].mxu0  ;;  %675 = vadd.xlane.f32.xlu0 %v674_v2  ;;  %v254_v3 = vpop.f32.mrb[6].mxu1  ;;  %v336_v38 = vmul.f32 %v251_v26, %v251_v26  ;;  %v680_v42 = vsel %vm79_vm2, %v251_v26, 0.0 }
 0x1b6   :  { %v1080_v33 = vpop.f32.mrb[7].mxu0  ;;  %v677_v34 = vsel %vm79_vm2, %v210_v32, 0.0  ;;  %v335_v35 = vmul.f32 %v210_v32, %v210_v32  ;;  %v1086_v7 = vpop.f32.mrb[7].mxu1  ;;  %v319_v36 = vmul.f32 %v210_v32, %v1215_v25  ;;  %v338_v37 = vsel %vm79_vm2, %v334_v29, 0.0 }
 0x1b7   :  { %678 = vadd.xlane.f32.xlu1 %v677_v34  ;;  %v321_v39 = vmul.f32 %v254_v3, %v1219_v27  ;;  %v337_v40 = vmul.f32 %v254_v3, %v254_v3  ;;  %v344_v22 = vsel %vm79_vm2, %v336_v38, 0.0  ;;  %v354_v25 = vlaneseq }
 0x1b8   :  { %v341_v21 = vsel %vm79_vm2, %v335_v35, 0.0  ;;  %v683_v43 = vsel %vm79_vm2, %v254_v3, 0.0  ;;  %v322_v27 = vsel %vm79_vm2, %v318_v30, 0.0  ;;  %v325_v46 = vsel %vm79_vm2, %v319_v36, 0.0 }
 0x1b9   :  { %339 = vadd.xlane.f32.xlu0 %v338_v37  ;;  %v347_v41 = vsel %vm79_vm2, %v337_v40, 0.0  ;;  %v355_v44 = vand.u32 127, %v354_v25  ;;  %v357_v45 = vshrl.u32 %v354_v25, 7  ;;  %v328_v48 = vsel %vm79_vm2, %v320_v6, 0.0 }
 0x1ba   :  { %v331_v50 = vsel %vm79_vm2, %v321_v39, 0.0 }
 0x1bb   :  { %342 = vadd.xlane.f32.xlu1 %v341_v21  ;;  %v1299_v49 = vsub.s32 %v355_v44, %v357_v45  ;;  %v360_v56 = vadd.s32 4294967288, %v355_v44 }
 0x1bd   :  { %345 = vadd.xlane.f32.xlu0 %v344_v22  ;;  %v1315_v61 = vsub.s32 %v360_v56, %v357_v45 }
 0x1bf   :  { %348 = vadd.xlane.f32.xlu1 %v347_v41 }
 0x1c1   :  { %681 = vadd.xlane.f32.xlu0 %v680_v42 }
 0x1c3   :  { %684 = vadd.xlane.f32.xlu1 %v683_v43 }
 0x1c5   :  { %323 = vadd.xlane.f32.xlu0 %v322_v27 }
 0x1c7   :  { %326 = vadd.xlane.f32.xlu1 %v325_v46  ;;  %v73_v47 = vpop.xlane.xlu0 %72 }
 0x1c8   :  { %v798_v53 = vrot.slane %v73_v47, %v1299_v49 }
 0x1c9   :  { %329 = vadd.xlane.f32.xlu0 %v328_v48 }
 0x1cb   :  { %332 = vadd.xlane.f32.xlu1 %v331_v50  ;;  %v76_v51 = vpop.xlane.xlu1 %75  ;;  %v1302_v52 = vpop.xlane.xlu0 %295 }
 0x1cc   :  { %v802_v54 = vrot.slane %v76_v51, %v1299_v49  ;;  %v565_v60 = vmul.f32 %v1302_v52, %v1302_v52  ;;  %v421_v2 = vrot.slane %v1302_v52, %v1299_v49 }
 0x1ce   :  { %v803_v55 = vsel %vm376_vm4, %v802_v54, %v798_v53  ;;  %v576_v5 = vrot.slane %v565_v60, %v1299_v49 }
 0x1cf   :  { %v1307_v57 = vpop.xlane.xlu1 %298  ;;  %1090 = vmatmul.mubr.msk.f32.vlgmr.msra.gmra.mrb[8].mxu0 %vm804_vm5, %v803_v55  ;;  %v1309_v58 = vpop.xlane.xlu0 %301 }
 0x1d0   :  { %v566_v59 = vmul.f32 %v1307_v57, %v1307_v57  ;;  %v567_v62 = vmul.f32 %v1309_v58, %v1309_v58  ;;  %v425_v18 = vrot.slane %v1307_v57, %v1315_v61  ;;  %v430_v19 = vrot.slane %v1309_v58, %v1299_v49 }
 0x1d2   :  { %v580_v1 = vrot.slane %v566_v59, %v1315_v61  ;;  %v585_v8 = vrot.slane %v567_v62, %v1299_v49  ;;  %v426_v33 = vsel %vm365_vm6, %v425_v18, %v421_v2 }
 0x1d3   :  { %v1319_v63 = vpop.xlane.xlu1 %304  ;;  %v602_v0 = vpop.xlane.xlu0 %601 }
 0x1d4   :  { %v568_v4 = vmul.f32 %v1319_v63, %v1319_v63  ;;  %v581_v12 = vsel %vm365_vm6, %v580_v1, %v576_v5  ;;  %v434_v14 = vrot.slane %v1319_v63, %v1315_v61  ;;  %v619_v24 = vrot.slane %v602_v0, %v1299_v49 }
 0x1d6   :  { %v589_v9 = vrot.slane %v568_v4, %v1315_v61  ;;  %v435_v29 = vsel %vm365_vm6, %v434_v14, %v430_v19 }
 0x1d7   :  { %v605_v10 = vpop.xlane.xlu1 %604  ;;  %v608_v11 = vpop.xlane.xlu0 %607  ;;  %v436_v35 = vsel %vm376_vm4, %v435_v29, %v426_v33 }
 0x1d8   :  { %v590_v13 = vsel %vm365_vm6, %v589_v9, %v585_v8  ;;  %v623_v16 = vrot.slane %v605_v10, %v1315_v61  ;;  %v628_v26 = vrot.slane %v608_v11, %v1299_v49  ;;  %v438_v38 = vsel %vm379_vm7, %v436_v35, 0.0 }
 0x1d9   :  { %v591_v15 = vsel %vm376_vm4, %v590_v13, %v581_v12 }
 0x1da   :  { %v593_v17 = vsel %vm379_vm7, %v591_v15, 0.0  ;;  %v624_v30 = vsel %vm365_vm6, %v623_v16, %v619_v24 }
 0x1db   :  { %v611_v20 = vpop.xlane.xlu1 %610  ;;  %594 = vadd.xlane.f32.xlu0 %v593_v17  ;;  %v308_v23 = vpop.xlane.xlu0 %307 }
 0x1dc   :  { %v632_v28 = vrot.slane %v611_v20, %v1315_v61  ;;  %v448_v39 = vrot.slane %v308_v23, %v1299_v49 }
 0x1de   :  { %v633_v31 = vsel %vm365_vm6, %v632_v28, %v628_v26 }
 0x1df   :  { %v311_v32 = vpop.xlane.xlu1 %310  ;;  %v314_v6 = vpop.xlane.xlu0 %313  ;;  %v634_v3 = vsel %vm376_vm4, %v633_v31, %v624_v30 }
 0x1e0   :  { %v636_v34 = vsel %vm379_vm7, %v634_v3, 0.0  ;;  %v452_v7 = vrot.slane %v311_v32, %v1315_v61  ;;  %v457_v21 = vrot.slane %v314_v6, %v1299_v49 }
 0x1e1   :  { %637 = vadd.xlane.f32.xlu0 %v636_v34 }
 0x1e2   :  { %v453_v41 = vsel %vm365_vm6, %v452_v7, %v448_v39 }
 0x1e3   :  { %v317_v36 = vpop.xlane.xlu1 %316  ;;  %v280_v37 = vpop.xlane.xlu0 %279 }
 0x1e4   :  { %v461_v40 = vrot.slane %v317_v36, %v1315_v61  ;;  %v639_v22 = vmul.f32 %v280_v37, %v280_v37  ;;  %v747_v43 = vrot.slane %v280_v37, %v1299_v49 }
 0x1e5   :  { %439 = vadd.xlane.f32.xlu0 %v438_v38 }
 0x1e6   :  { %v462_v42 = vsel %vm365_vm6, %v461_v40, %v457_v21  ;;  %v643_v25 = vmul.f32 %v639_v22, %v280_v37  ;;  %v720_v50 = vrot.slane %v639_v22, %v1299_v49 }
 0x1e7   :  { %v283_v27 = vpop.xlane.xlu1 %282  ;;  %v286_v44 = vpop.xlane.xlu0 %285  ;;  %v463_v45 = vsel %vm376_vm4, %v462_v42, %v453_v41 }
 0x1e8   :  { %v640_v46 = vmul.f32 %v283_v27, %v283_v27  ;;  %v751_v47 = vrot.slane %v283_v27, %v1315_v61  ;;  %v641_v48 = vmul.f32 %v286_v44, %v286_v44  ;;  %v465_v51 = vsel %vm379_vm7, %v463_v45, 0.0 }
 0x1e9   :  { %v756_v56 = vrot.slane %v286_v44, %v1299_v49  ;;  %466 = vadd.xlane.f32.xlu1 %v465_v51  ;;  %v654_v59 = vrot.slane %v643_v25, %v1299_v49 }
 0x1ea   :  { %v644_v53 = vmul.f32 %v640_v46, %v283_v27  ;;  %v724_v54 = vrot.slane %v640_v46, %v1315_v61  ;;  %v645_v55 = vmul.f32 %v641_v48, %v286_v44  ;;  %v752_v0 = vsel %vm365_vm6, %v751_v47, %v747_v43 }
 0x1eb   :  { %v289_v60 = vpop.xlane.xlu1 %288  ;;  %v264_v62 = vpop.xlane.xlu0 %263  ;;  %v729_v4 = vrot.slane %v641_v48, %v1299_v49 }
 0x1ec   :  { %v658_v1 = vrot.slane %v644_v53, %v1315_v61  ;;  %v642_v5 = vmul.f32 %v289_v60, %v289_v60  ;;  %v760_v8 = vrot.slane %v289_v60, %v1315_v61  ;;  %v663_v9 = vrot.slane %v645_v55, %v1299_v49 }
 0x1ed   :  { %v383_v10 = vmul.f32 %v264_v62, %v264_v62  ;;  %v522_v11 = vmul.f32 %v1302_v52, %v264_v62  ;;  %v725_v12 = vsel %vm365_vm6, %v724_v54, %v720_v50  ;;  %v359_v15 = vrot.slane %v264_v62, %v1299_v49 }
 0x1ee   :  { %v646_v13 = vmul.f32 %v642_v5, %v289_v60  ;;  %v733_v14 = vrot.slane %v642_v5, %v1315_v61  ;;  %v761_v16 = vsel %vm365_vm6, %v760_v8, %v756_v56  ;;  %v659_v19 = vsel %vm365_vm6, %v658_v1, %v654_v59 }
 0x1ef   :  { %v267_v17 = vpop.xlane.xlu1 %266  ;;  %v1375_v18 = vpop.xlane.xlu0 %269  ;;  %v1379_v20 = vsel %vm376_vm4, %v761_v16, %v752_v0  ;;  %v394_v28 = vrot.slane %v383_v10, %v1299_v49 }
 0x1f0   :  { %v667_v23 = vrot.slane %v646_v13, %v1315_v61  ;;  %v364_v52 = vrot.slane %v267_v17, %v1315_v61  ;;  %v384_v24 = vmul.f32 %v267_v17, %v267_v17  ;;  %v523_v26 = vmul.f32 %v1307_v57, %v267_v17 }
 0x1f1   :  { %v385_v2 = vmul.f32 %v1375_v18, %v1375_v18  ;;  %v524_v29 = vmul.f32 %v1309_v58, %v1375_v18  ;;  %v734_v30 = vsel %vm365_vm6, %v733_v14, %v729_v4  ;;  %v533_v57 = vrot.slane %v522_v11, %v1299_v49 }
 0x1f2   :  { %v398_v31 = vrot.slane %v384_v24, %v1315_v61  ;;  %v537_v32 = vrot.slane %v523_v26, %v1315_v61  ;;  %v668_v6 = vsel %vm365_vm6, %v667_v23, %v663_v9  ;;  %v366_v3 = vsel %vm365_vm6, %v364_v52, %v359_v15 }
 0x1f3   :  { %v273_v33 = vpop.xlane.xlu1 %272  ;;  %v669_v34 = vsel %vm376_vm4, %v668_v6, %v659_v19  ;;  %v1397_v35 = vsel %vm376_vm4, %v734_v30, %v725_v12  ;;  %v403_v58 = vrot.slane %v385_v2, %v1299_v49  ;;  %v542_v39 = vrot.slane %v524_v29, %v1299_v49 }
 0x1f4   :  { %v386_v7 = vmul.f32 %v273_v33, %v273_v33  ;;  %v525_v36 = vmul.f32 %v1319_v63, %v273_v33  ;;  %v671_v37 = vsel %vm379_vm7, %v669_v34, 0.0  ;;  %v538_v38 = vsel %vm365_vm6, %v537_v32, %v533_v57 }
 0x1f5   :  { %v399_v22 = vsel %vm365_vm6, %v398_v31, %v394_v28  ;;  %672 = vadd.xlane.f32.xlu0 %v671_v37  ;;  %v370_v55 = vrot.slane %v1375_v18, %v1299_v49  ;;  %v374_v59 = vrot.slane %v273_v33, %v1315_v61  ;;  %v737_v6 = vsel %vm379_vm7, %v1397_v35, 0.0 }
 0x1f6   :  { %v407_v21 = vrot.slane %v386_v7, %v1315_v61  ;;  %v546_v40 = vrot.slane %v525_v36, %v1315_v61 }
 0x1f7   :  { %v375_v14 = vsel %vm365_vm6, %v374_v59, %v370_v55 }
 0x1f8   :  { %v408_v41 = vsel %vm365_vm6, %v407_v21, %v403_v58  ;;  %v547_v42 = vsel %vm365_vm6, %v546_v40, %v542_v39  ;;  %v377_v23 = vsel %vm376_vm4, %v375_v14, %v366_v3 }
 0x1f9   :  { %v409_v25 = vsel %vm376_vm4, %v408_v41, %v399_v22  ;;  %v548_v63 = vsel %vm376_vm4, %v547_v42, %v538_v38  ;;  %v380_v29 = vsel %vm379_vm7, %v377_v23, 0.0 }
 0x1fa   :  { %v411_v43 = vsel %vm379_vm7, %v409_v25, 0.0  ;;  %v550_v17 = vsel %vm379_vm7, %v548_v63, 0.0 }
 0x1fb   :  { %412 = vadd.xlane.f32.xlu1 %v411_v43 }
 0x242   :  { %v676_v27 = vpop.xlane.xlu0 %675 }
 0x243   :  { %v693_v5 = vrot.slane %v676_v27, %v1299_v49 }
 0x244   :  { %v679_v44 = vpop.xlane.xlu1 %678 }
 0x245   :  { %v697_v60 = vrot.slane %v679_v44, %v1315_v61 }
 0x246   :  { %v340_v45 = vpop.xlane.xlu0 %339 }
 0x247   :  { %v502_v51 = vrot.slane %v340_v45, %v1299_v49  ;;  %v698_v12 = vsel %vm365_vm6, %v697_v60, %v693_v5 }
 0x248   :  { %v343_v46 = vpop.xlane.xlu1 %342 }
 0x249   :  { %v506_v48 = vrot.slane %v343_v46, %v1315_v61 }
 0x24a   :  { %v346_v47 = vpop.xlane.xlu0 %345 }
 0x24b   :  { %v511_v53 = vrot.slane %v346_v47, %v1299_v49  ;;  %v507_v62 = vsel %vm365_vm6, %v506_v48, %v502_v51 }
 0x24c   :  { %v349_v50 = vpop.xlane.xlu1 %348 }
 0x24d   :  { %v515_v54 = vrot.slane %v349_v50, %v1315_v61 }
 0x24e   :  { %v682_v56 = vpop.xlane.xlu0 %681 }
 0x24f   :  { %v516_v0 = vsel %vm365_vm6, %v515_v54, %v511_v53  ;;  %v702_v8 = vrot.slane %v682_v56, %v1299_v49  ;;  %v1037_v56 = vld [vmem:[%s1489_s3] ss:$0 sm:$0xff] }
 0x250   :  { %v685_v1 = vpop.xlane.xlu1 %684  ;;  %v517_v4 = vsel %vm376_vm4, %v516_v0, %v507_v62 }
 0x251   :  { %v706_v9 = vrot.slane %v685_v1, %v1315_v61  ;;  %v519_v10 = vsel %vm379_vm7, %v517_v4, 0.0  ;;  %v1040_v1 = vld [vmem:[%s1489_s3 + $0x1] ss:$0 sm:$0xff] }
 0x252   :  { %520 = vadd.xlane.f32.xlu1 %v519_v10  ;;  %v324_v11 = vpop.xlane.xlu0 %323 }
 0x253   :  { %v707_v13 = vsel %vm365_vm6, %v706_v9, %v702_v8  ;;  %v475_v26 = vrot.slane %v324_v11, %v1299_v49  ;;  %v1041_v8 = vld [vmem:[%s1489_s3 + $0x2] ss:$0 sm:$0xff] }
 0x254   :  { %v327_v15 = vpop.xlane.xlu1 %326  ;;  %v708_v16 = vsel %vm376_vm4, %v707_v13, %v698_v12 }
 0x255   :  { %v710_v18 = vsel %vm379_vm7, %v708_v16, 0.0  ;;  %v479_v52 = vrot.slane %v327_v15, %v1315_v61 }
 0x256   :  { %551 = vadd.xlane.f32.xlu1 %v550_v17  ;;  %711 = vadd.xlane.f32.xlu0 %v710_v18  ;;  %v330_v19 = vpop.xlane.xlu0 %329  ;;  %v1042_v17 = vld [vmem:[%s1489_s3 + $0x3] ss:$0 sm:$0xff] }
 0x257   :  { %v484_v28 = vrot.slane %v330_v19, %v1299_v49  ;;  %v480_v30 = vsel %vm365_vm6, %v479_v52, %v475_v26  ;;  %v764_v49 = vsel %vm379_vm7, %v1379_v20, 0.0 }
 0x258   :  { %v333_v24 = vpop.xlane.xlu1 %332 }
 0x259   :  { %v488_v2 = vrot.slane %v333_v24, %v1315_v61  ;;  %v1043_v24 = vld [vmem:[%s1490_s4] ss:$0 sm:$0xff] }
 0x25a   :  { %381 = vadd.xlane.f32.xlu1 %v380_v29 }
 0x25b   :  { %v489_v31 = vsel %vm365_vm6, %v488_v2, %v484_v28 }
 0x25c   :  { %v490_v32 = vsel %vm376_vm4, %v489_v31, %v480_v30 }
 0x25d   :  { %v492_v3 = vsel %vm379_vm7, %v490_v32, 0.0 }
 0x25e   :  { %738 = vadd.xlane.f32.xlu1 %v737_v6  ;;  %493 = vadd.xlane.f32.xlu0 %v492_v3  ;;  %v942_v3 = vld [vmem:[%s1491_s7] sm:$0xff] }
 0x262   :  { %765 = vadd.xlane.f32.xlu0 %v764_v49  ;;  %v943_v49 = vld [vmem:[%s1491_s7 + $0x8] sm:$0xff] }
 0x268   :  { %v595_v33 = vpop.xlane.xlu0 %594 }
 0x269   :  { %v767_v36 = vmul.f32 3.0, %v595_v33  ;;  %v944_v33 = vld [vmem:[%s1491_s7 + $0x10] sm:$0xff] }
 0x26e   :  { %v638_v58 = vpop.xlane.xlu0 %637 }
 0x26f   :  { %v769_v39 = vmul.f32 9.0, %v638_v58 }
 0x272   :  { %v440_v37 = vpop.xlane.xlu0 %439 }
 0x273   :  { %v774_v63 = vmul.f32 4.0, %v440_v37  ;;  %v554_v53 = vmul.f32 0.16666667, %v440_v37 }
 0x275   :  { %v792_v5 = vmul.f32 %v1037_v56, %v554_v53 }
 0x276   :  { %v467_v34 = vpop.xlane.xlu1 %466 }
 0x277   :  { %v771_v35 = vmul.f32 6.0, %v467_v34 }
 0x282   :  { %v673_v41 = vpop.xlane.xlu0 %672 }
 0x283   :  { %v776_v45 = vmul.f32 4.0, %v673_v41 }
 0x288   :  { %v413_v7 = vpop.xlane.xlu1 %412 }
 0x289   :  { %v555_v40 = vmul.f32 2.0, %v413_v7  ;;  %v14_v7 = vstv %s1492_s8 }
 0x28a   :  { %15 = vst [vmem:[#allocation2] sm:$0x1] %v14_v7 }
 0x28b   :  { %v556_v43 = vsub.f32 %v467_v34, %v555_v40  ;;  %v945_v34 = vld [vmem:[%s1491_s7 + $0x18] sm:$0xff]  ;;  %v1045_v40 = vld [vmem:[%s1494_s6] ss:$0 sm:$0xff] }
 0x28c   :  { %v1107_v58 = vpack.c.bf16 %v945_v34, %v944_v33 }
 0x2a2   :  { %v877_v61 = vpop.f32.mrb[8].mxu0 }
 0x2a3   :  { %v1091_v57 = vpop.f32.mrb[9].mxu0  ;;  %v878_v14 = vadd.f32 %v877_v61, %v792_v5  ;;  %v1104_v61 = vpack.c.bf16 %v943_v49, %v942_v3 }
 0x2a4   :  { %v1120_v57 = vmov 0.0|0.0  }
 0x2a5   :  { %1103 = vmatprep.subr.bf16.mxu1 %v1120_v57 }
 0x2a6   :  { %1105 = vmatpush3.bf16.msra.mxu1 %v1104_v61 }
 0x2a7   :  { %1106 = vmatprep.subr.bf16.mxu1 %v1120_v57 }
 0x2aa   :  { %1108 = vmatpush3.bf16.msra.mxu1 %v1107_v58 }
 0x2df   :  { %v521_v38 = vpop.xlane.xlu1 %520 }
 0x2e0   :  { %v768_v21 = vsub.f32 %v521_v38, %v767_v36 }
 0x2e2   :  { %v770_v22 = vadd.f32 %v769_v39, %v768_v21  ;;  %v1044_v21 = vld [vmem:[%s1493_s5] ss:$0 sm:$0xff] }
 0x2e3   :  { %v552_v42 = vpop.xlane.xlu1 %551  ;;  %v712_v27 = vpop.xlane.xlu0 %711 }
 0x2e4   :  { %v772_v25 = vsub.f32 %v770_v22, %v771_v35  ;;  %v560_v48 = vmul.f32 3.0, %v552_v42  ;;  %v778_v51 = vmul.f32 3.0, %v712_v27 }
 0x2e6   :  { %v773_v20 = vadd.f32 %v772_v25, %v771_v35  ;;  %v1046_v25 = vld [vmem:[#allocation2] ss:$0 sm:$0xff] }
 0x2e7   :  { %v382_v44 = vpop.xlane.xlu1 %381 }
 0x2e8   :  { %v775_v46 = vsub.f32 %v773_v20, %v774_v63  ;;  %v557_v47 = vadd.f32 %v556_v43, %v382_v44 }
 0x2ea   :  { %v777_v50 = vadd.f32 %v776_v45, %v775_v46  ;;  %v559_v60 = vmul.f32 0.125, %v557_v47 }
 0x2eb   :  { %v739_v54 = vpop.xlane.xlu1 %738  ;;  %v494_v55 = vpop.xlane.xlu0 %493 }
 0x2ec   :  { %v779_v59 = vadd.f32 %v778_v51, %v777_v50  ;;  %v780_v62 = vmul.f32 12.0, %v739_v54  ;;  %v561_v0 = vsub.f32 %v494_v55, %v560_v48  ;;  %v886_v10 = vmul.f32 %v1040_v1, %v559_v60 }
 0x2ee   :  { %v562_v4 = vadd.f32 %v561_v0, %v440_v37  ;;  %v781_v11 = vsub.f32 %v779_v59, %v780_v62  ;;  %v887_v18 = vadd.f32 %v886_v10, %v878_v14 }
 0x2ef   :  { %v766_v9 = vpop.xlane.xlu0 %765 }
 0x2f0   :  { %v564_v12 = vmul.f32 0.1, %v562_v4  ;;  %v782_v13 = vmul.f32 12.0, %v766_v9 }
 0x2f2   :  { %v893_v15 = vmul.f32 %v1041_v8, %v564_v12  ;;  %v783_v16 = vadd.f32 %v782_v13, %v781_v11 }
 0x2f4   :  { %v785_v19 = vmul.f32 0.083333336, %v783_v16  ;;  %v894_v52 = vadd.f32 %v893_v15, %v887_v18 }
 0x2f6   :  { %v900_v23 = vmul.f32 %v1042_v17, %v785_v19 }
 0x2f8   :  { %v901_v26 = vadd.f32 %v900_v23, %v894_v52 }
 0x2fa   :  { %v909_v28 = vadd.f32 %v1043_v24, %v901_v26 }
 0x2fc   :  { %v911_v2 = vsel %vm910_vm8, %v909_v28, 0.0 }
 0x2fd   :  { %912 = vadd.xlane.f32.xlu1 %v911_v2 }
 0x38a   :  { %v913_v29 = vpop.xlane.xlu1 %912 }
 0x38b   :  { %v915_v30 = vmul.f32 0.03125, %v913_v29 }
 0x38d   :  { %v916_v31 = vsub.f32 %v909_v28, %v915_v30 }
 0x38f   :  { %v917_v32 = vmul.f32 %v916_v31, %v916_v31 }
 0x391   :  { %v918_v6 = vsel %vm910_vm8, %v917_v32, 0.0 }
 0x392   :  { %919 = vadd.xlane.f32.xlu0 %v918_v6 }
 0x41f   :  { %v920_v36 = vpop.xlane.xlu0 %919 }
 0x420   :  { %v921_v37 = vmul.f32 0.03125, %v920_v36 }
 0x422   :  { %v922_v38 = vadd.f32 1e-05, %v921_v37 }
 0x424   :  { %1116 = vrsqrt.f32 %v922_v38 }
 0x42e   :  { %v1117_v39 = vpop.eup %1116 }
 0x42f   :  { %v924_v35 = vmul.f32 %v1117_v39, %v916_v31 }
 0x431   :  { %v932_v22 = vmul.f32 %v1044_v21, %v924_v35 }
 0x433   :  { %v940_v41 = vadd.f32 %v1045_v40, %v932_v22 }
 0x435   :  { %v941_v42 = vmax.f32 %v940_v41, 0.0 }
 0x437   :  { %1101 = vmatmul.mubr.msk.f32.vlgmr.msra.gmra.mrb[8].mxu1 %vm953_vm9, %v941_v42 }
 0x50a   :  { %v1023_v63 = vpop.f32.mrb[8].mxu1 }
 0x50b   :  { %v1024_v20 = vadd.f32 %v1046_v25, %v1023_v63  ;;  %v1102_v43 = vpop.f32.mrb[9].mxu1 }
 0x50d   :  { %1028 = vst.msk [vmem:[%s1495_s9] sm:$0x3] %vm1027_vm10, %v1024_v20 }

</bundles_post_ra>
